<compile_context>
chip_gen: v7x
topology: tpu7x:2x2x1
jax: 0.10.0
libtpu: 0.0.40
codegen_flags: <defaults>
</compile_context>

<pallas_src>
import functools

import jax
import jax.numpy as jnp
from jax.experimental import pallas as pl
from jax.experimental.pallas import tpu as pltpu

IN_DIM, H1, H2, OUT_DIM = 42, 128, 64, 32
K_PAD = 64          # padded input-feature dim (zero-padded; exact math)
TM_MAX = 512        # rows per batch tile (multiple of 8, VMEM-safe on v5e/v6e/v7x)


def _round_up(x, m):
    return ((x + m - 1) // m) * m


def siamese_kernel(x_ref, w1_ref, b1_ref, w2_ref, b2_ref, w3_ref, b3_ref, o_ref):
    """One fused forward pass over a [TM, K_PAD] tile of the stacked batch."""
    h = jnp.dot(x_ref[...], w1_ref[...], preferred_element_type=jnp.float32) + b1_ref[...]
    h = jnp.maximum(h, 0.0)
    h = jnp.dot(h, w2_ref[...], preferred_element_type=jnp.float32) + b2_ref[...]
    h = jnp.maximum(h, 0.0)
    y = jnp.dot(h, w3_ref[...], preferred_element_type=jnp.float32) + b3_ref[...]
    o_ref[...] = y.astype(o_ref.dtype)


@functools.partial(jax.jit, static_argnames=())
def siamese_forward(x1, x2, params):
    """params: dict with w1,b1,w2,b2,w3,b3 (weights stored as [in, out])."""
    B = x1.shape[0]
    M = 2 * B

    # Fuse the two branches (shared weights) into one [2B, IN] pass.
    x = jnp.concatenate([x1, x2], axis=0).astype(jnp.float32)

    # Batch tiling: TM rows per grid step, rows padded to a multiple of TM.
    TM = min(TM_MAX, _round_up(M, 8))
    M_pad = _round_up(M, TM)

    # Zero-pad batch rows and the feature dim (42 -> K_PAD); pad w1 rows with
    # zeros so the matmul result is bit-identical.
    x = jnp.pad(x, ((0, M_pad - M), (0, K_PAD - IN_DIM)))
    w1 = jnp.pad(params["w1"], ((0, K_PAD - IN_DIM), (0, 0)))
    b1, w2, b2, w3, b3 = (params["b1"], params["w2"], params["b2"],
                          params["w3"], params["b3"])

    grid = (M_pad // TM,)
    const = lambda i: (0, 0)   # weights/biases: resident, DMA'd once

    flops = 2 * M_pad * (K_PAD * H1 + H1 * H2 + H2 * OUT_DIM)
    bytes_accessed = 4 * (M_pad * K_PAD + M_pad * OUT_DIM
                          + K_PAD * H1 + H1 * H2 + H2 * OUT_DIM
                          + H1 + H2 + OUT_DIM)

    out = pl.pallas_call(
        siamese_kernel,
        out_shape=jax.ShapeDtypeStruct((M_pad, OUT_DIM), jnp.float32),
        grid=grid,
        in_specs=[
            pl.BlockSpec((TM, K_PAD), lambda i: (i, 0)),   # x tile
            pl.BlockSpec((K_PAD, H1), const),              # w1 (padded)
            pl.BlockSpec((1, H1), const),                  # b1
            pl.BlockSpec((H1, H2), const),                 # w2
            pl.BlockSpec((1, H2), const),                  # b2
            pl.BlockSpec((H2, OUT_DIM), const),            # w3
            pl.BlockSpec((1, OUT_DIM), const),             # b3
        ],
        out_specs=pl.BlockSpec((TM, OUT_DIM), lambda i: (i, 0)),
        compiler_params=pltpu.CompilerParams(
            dimension_semantics=("parallel",)),
        cost_estimate=pl.CostEstimate(
            flops=flops, transcendentals=0, bytes_accessed=bytes_accessed),
    )(x, w1, b1, w2, b2, w3, b3)

    return out[:B], out[B:M]


def init_params(key):
    """Deterministic init mimicking PyTorch nn.Linear default U(-1/sqrt(in), 1/sqrt(in))."""
    ks = jax.random.split(key, 6)

    def linear(kw, kb, fan_in, fan_out):
        bound = 1.0 / jnp.sqrt(fan_in)
        w = jax.random.uniform(kw, (fan_in, fan_out), jnp.float32, -bound, bound)
        b = jax.random.uniform(kb, (1, fan_out), jnp.float32, -bound, bound)
        return w, b

    w1, b1 = linear(ks[0], ks[1], IN_DIM, H1)
    w2, b2 = linear(ks[2], ks[3], H1, H2)
    w3, b3 = linear(ks[4], ks[5], H2, OUT_DIM)
    return dict(w1=w1, b1=b1, w2=w2, b2=b2, w3=w3, b3=b3)


def reference_forward(x1, x2, p):
    def fwd(x):
        h = jnp.maximum(x @ p["w1"] + p["b1"], 0.0)
        h = jnp.maximum(h @ p["w2"] + p["b2"], 0.0)
        return h @ p["w3"] + p["b3"]
    return fwd(x1), fwd(x2)


if __name__ == "__main__":
    key = jax.random.PRNGKey(0)
    kp, k1, k2 = jax.random.split(key, 3)

    params = init_params(kp)
    B = 2
    x1 = jax.random.normal(k1, (B, IN_DIM), jnp.float32)
    x2 = jax.random.normal(k2, (B, IN_DIM), jnp.float32)

    o1, o2 = siamese_forward(x1, x2, params)
    jax.block_until_ready((o1, o2))

    r1, r2 = reference_forward(x1, x2, params)
    assert o1.shape == (B, OUT_DIM) and o2.shape == (B, OUT_DIM)
    assert jnp.allclose(o1, r1, atol=1e-5, rtol=1e-5)
    assert jnp.allclose(o2, r2, atol=1e-5, rtol=1e-5)

    print("KERNEL_OK")
</pallas_src>

<mosaic_0001>
module attributes {stable_mosaic.version = 11 : i64} {
  func.func @siamese_kernel(%arg0: i32, %arg1: memref<8x64xf32, #tpu.memory_space<vmem>>, %arg2: memref<64x128xf32, #tpu.memory_space<vmem>>, %arg3: memref<1x128xf32, #tpu.memory_space<vmem>>, %arg4: memref<128x64xf32, #tpu.memory_space<vmem>>, %arg5: memref<1x64xf32, #tpu.memory_space<vmem>>, %arg6: memref<64x32xf32, #tpu.memory_space<vmem>>, %arg7: memref<1x32xf32, #tpu.memory_space<vmem>>, %arg8: memref<8x32xf32, #tpu.memory_space<vmem>>) attributes {dimension_semantics = [#tpu.dimension_semantics<parallel>], iteration_bounds = array<i64: 1>, scalar_prefetch = 0 : i64, scratch_operands = 0 : i64, tpu.core_type = #tpu.core_type<tc>, window_params = [{transform_indices = @transform_0, window_bounds = array<i64: 8, 64>}, {pipeline_mode = #tpu.pipeline_mode<synchronous>, transform_indices = @transform_1, window_bounds = array<i64: 64, 128>}, {pipeline_mode = #tpu.pipeline_mode<synchronous>, transform_indices = @transform_2, window_bounds = array<i64: 1, 128>}, {pipeline_mode = #tpu.pipeline_mode<synchronous>, transform_indices = @transform_3, window_bounds = array<i64: 128, 64>}, {pipeline_mode = #tpu.pipeline_mode<synchronous>, transform_indices = @transform_4, window_bounds = array<i64: 1, 64>}, {pipeline_mode = #tpu.pipeline_mode<synchronous>, transform_indices = @transform_5, window_bounds = array<i64: 64, 32>}, {pipeline_mode = #tpu.pipeline_mode<synchronous>, transform_indices = @transform_6, window_bounds = array<i64: 1, 32>}, {transform_indices = @transform_7, window_bounds = array<i64: 8, 32>}]} {
    %c0 = arith.constant 0 : index
    %c0_0 = arith.constant 0 : index
    %0 = vector.load %arg1[%c0, %c0_0] : memref<8x64xf32, #tpu.memory_space<vmem>>, vector<8x64xf32>
    %c0_1 = arith.constant 0 : index
    %c0_2 = arith.constant 0 : index
    %1 = vector.load %arg2[%c0_1, %c0_2] : memref<64x128xf32, #tpu.memory_space<vmem>>, vector<64x128xf32>
    %cst = arith.constant dense<0.000000e+00> : vector<8x128xf32>
    %2 = tpu.matmul %0, %1, %cst {dimension_numbers = #tpu.dot_dimension_numbers<[1], [0], [0], [1], [0, 0, 1, 1], [], []>} : vector<8x64xf32>, vector<64x128xf32>, vector<8x128xf32> -> vector<8x128xf32>
    %c0_3 = arith.constant 0 : index
    %c0_4 = arith.constant 0 : index
    %3 = vector.load %arg3[%c0_3, %c0_4] : memref<1x128xf32, #tpu.memory_space<vmem>>, vector<1x128xf32>
    %4 = vector.broadcast %3 : vector<1x128xf32> to vector<8x128xf32>
    %5 = arith.addf %2, %4 : vector<8x128xf32>
    %cst_5 = arith.constant 0.000000e+00 : f32
    %6 = vector.broadcast %cst_5 : f32 to vector<8x128xf32>
    %7 = arith.maximumf %5, %6 : vector<8x128xf32>
    %c0_6 = arith.constant 0 : index
    %c0_7 = arith.constant 0 : index
    %8 = vector.load %arg4[%c0_6, %c0_7] : memref<128x64xf32, #tpu.memory_space<vmem>>, vector<128x64xf32>
    %cst_8 = arith.constant dense<0.000000e+00> : vector<8x64xf32>
    %9 = tpu.matmul %7, %8, %cst_8 {dimension_numbers = #tpu.dot_dimension_numbers<[1], [0], [0], [1], [0, 0, 1, 1], [], []>} : vector<8x128xf32>, vector<128x64xf32>, vector<8x64xf32> -> vector<8x64xf32>
    %c0_9 = arith.constant 0 : index
    %c0_10 = arith.constant 0 : index
    %10 = vector.load %arg5[%c0_9, %c0_10] : memref<1x64xf32, #tpu.memory_space<vmem>>, vector<1x64xf32>
    %11 = vector.broadcast %10 : vector<1x64xf32> to vector<8x64xf32>
    %12 = arith.addf %9, %11 : vector<8x64xf32>
    %cst_11 = arith.constant 0.000000e+00 : f32
    %13 = vector.broadcast %cst_11 : f32 to vector<8x64xf32>
    %14 = arith.maximumf %12, %13 : vector<8x64xf32>
    %c0_12 = arith.constant 0 : index
    %c0_13 = arith.constant 0 : index
    %15 = vector.load %arg6[%c0_12, %c0_13] : memref<64x32xf32, #tpu.memory_space<vmem>>, vector<64x32xf32>
    %cst_14 = arith.constant dense<0.000000e+00> : vector<8x32xf32>
    %16 = tpu.matmul %14, %15, %cst_14 {dimension_numbers = #tpu.dot_dimension_numbers<[1], [0], [0], [1], [0, 0, 1, 1], [], []>} : vector<8x64xf32>, vector<64x32xf32>, vector<8x32xf32> -> vector<8x32xf32>
    %c0_15 = arith.constant 0 : index
    %c0_16 = arith.constant 0 : index
    %17 = vector.load %arg7[%c0_15, %c0_16] : memref<1x32xf32, #tpu.memory_space<vmem>>, vector<1x32xf32>
    %18 = vector.broadcast %17 : vector<1x32xf32> to vector<8x32xf32>
    %19 = arith.addf %16, %18 : vector<8x32xf32>
    %c0_17 = arith.constant 0 : index
    %c0_18 = arith.constant 0 : index
    %20 = vector.load %arg8[%c0_17, %c0_18] : memref<8x32xf32, #tpu.memory_space<vmem>>, vector<8x32xf32>
    tpu.vector_store %arg8[%c0_17, %c0_18], %19 {strides = array<i32>} : memref<8x32xf32, #tpu.memory_space<vmem>>, vector<8x32xf32>,
    return
  }
  func.func @transform_0(%arg0: i32) -> (i32, i32) {
    %c0_i32 = arith.constant 0 : i32
    %c0_i32_0 = arith.constant 0 : i32
    return %arg0, %c0_i32 : i32, i32
  }
  func.func @transform_1(%arg0: i32) -> (i32, i32) {
    %c0_i32 = arith.constant 0 : i32
    %c0_i32_0 = arith.constant 0 : i32
    %c0_i32_1 = arith.constant 0 : i32
    return %c0_i32, %c0_i32_0 : i32, i32
  }
  func.func @transform_2(%arg0: i32) -> (i32, i32) {
    %c0_i32 = arith.constant 0 : i32
    %c0_i32_0 = arith.constant 0 : i32
    %c0_i32_1 = arith.constant 0 : i32
    return %c0_i32, %c0_i32_0 : i32, i32
  }
  func.func @transform_3(%arg0: i32) -> (i32, i32) {
    %c0_i32 = arith.constant 0 : i32
    %c0_i32_0 = arith.constant 0 : i32
    %c0_i32_1 = arith.constant 0 : i32
    return %c0_i32, %c0_i32_0 : i32, i32
  }
  func.func @transform_4(%arg0: i32) -> (i32, i32) {
    %c0_i32 = arith.constant 0 : i32
    %c0_i32_0 = arith.constant 0 : i32
    %c0_i32_1 = arith.constant 0 : i32
    return %c0_i32, %c0_i32_0 : i32, i32
  }
  func.func @transform_5(%arg0: i32) -> (i32, i32) {
    %c0_i32 = arith.constant 0 : i32
    %c0_i32_0 = arith.constant 0 : i32
    %c0_i32_1 = arith.constant 0 : i32
    return %c0_i32, %c0_i32_0 : i32, i32
  }
  func.func @transform_6(%arg0: i32) -> (i32, i32) {
    %c0_i32 = arith.constant 0 : i32
    %c0_i32_0 = arith.constant 0 : i32
    %c0_i32_1 = arith.constant 0 : i32
    return %c0_i32, %c0_i32_0 : i32, i32
  }
  func.func @transform_7(%arg0: i32) -> (i32, i32) {
    %c0_i32 = arith.constant 0 : i32
    %c0_i32_0 = arith.constant 0 : i32
    return %arg0, %c0_i32 : i32, i32
  }
}

</mosaic_0001>

<bundles_post_ra>
// kernel: siamese_forward.1
= control target key start
LH: loop header
LB: loop body
LE: loop exit
PB: predicated region body
PF: predicated region fallthrough
CT: control target
= control target key end

     0   :  { %v469_v0 = vmov 0.0|0.0   ;;  %vm470_vm0 = vmmov 0   ;;  %v471_v4 = vmov 0.0   ;;  %vm42_vm1 = vcmask 523264   ;;  %s644_s1 = inlined_call_operand.vmem [shape: f32[64,128], index: 1, kind: input, shape index: {}]   ;;  %s645_s3 = inlined_call_operand.vmem [shape: f32[128,64], index: 3, kind: input, shape index: {}]   ;;  %s646_s0 = inlined_call_operand.vmem [shape: f32[8,64], index: 0, kind: input, shape index: {}]   ;;  %s647_s5 = inlined_call_operand.vmem [shape: f32[64,32], index: 5, kind: input, shape index: {}]   ;;  %s648_s2 = inlined_call_operand.vmem [shape: f32[1,128], index: 2, kind: input, shape index: {}]   ;;  %s649_s4 = inlined_call_operand.vmem [shape: f32[1,64], index: 4, kind: input, shape index: {}]   ;;  %s650_s6 = inlined_call_operand.vmem [shape: f32[1,32], index: 6, kind: input, shape index: {}]   ;;  %s651_s7 = inlined_call_operand.vmem [shape: f32[8,32], index: 7, kind: output, shape index: {}]  }
   0x1   :  { %418 = vmatprep.subr.bf16.mxu0 %v469_v0  ;;  %v27_v1 = vld [vmem:[%s644_s1] sm:$0xff]  ;;  %v28_v2 = vld [vmem:[%s644_s1 + $0x8] sm:$0xff]  ;;  %v29_v3 = vld [vmem:[%s644_s1 + $0x10] sm:$0xff]  ;;  %361 = vmatprep.mubr.msk.f32.mxu0 %vm470_vm0, %v471_v4  ;;  %vm299_vm2 = vcmask 261120  }
   0x2   :  { %v419_v5 = vpack.c.bf16 %v28_v2, %v27_v1  ;;  %v30_v6 = vld [vmem:[%s644_s1 + $0x18] sm:$0xff]  ;;  %430 = vmatprep.subr.bf16.mxu1 %v469_v0  ;;  %396 = vmatprep.mubr.msk.f32.mxu1 %vm470_vm0, %v471_v4  ;;  %v117_v8 = vld [vmem:[%s645_s3] sm:$0xff]  ;;  %v118_v9 = vld [vmem:[%s645_s3 + $0x8] sm:$0xff] }
   0x3   :  { %v422_v7 = vpack.c.bf16 %v30_v6, %v29_v3  ;;  %v119_v10 = vld [vmem:[%s645_s3 + $0x10] sm:$0xff]  ;;  %v31_v11 = vld [vmem:[%s644_s1 + $0x20] sm:$0xff]  ;;  %v32_v12 = vld [vmem:[%s644_s1 + $0x28] sm:$0xff]  ;;  %v431_v13 = vpack.c.bf16 %v118_v9, %v117_v8 }
   0x4   :  { %420 = vmatpush3.bf16.msra.mxu0 %v419_v5  ;;  %v120_v14 = vld [vmem:[%s645_s3 + $0x18] sm:$0xff]  ;;  %v425_v16 = vpack.c.bf16 %v32_v12, %v31_v11  ;;  %v121_v17 = vld [vmem:[%s645_s3 + $0x20] sm:$0xff]  ;;  %v122_v18 = vld [vmem:[%s645_s3 + $0x28] sm:$0xff] }
   0x5   :  { %421 = vmatprep.subr.bf16.mxu0 %v469_v0  ;;  %432 = vmatpush3.bf16.msra.mxu1 %v431_v13  ;;  %v434_v15 = vpack.c.bf16 %v120_v14, %v119_v10  ;;  %v33_v19 = vld [vmem:[%s644_s1 + $0x30] sm:$0xff]  ;;  %v34_v20 = vld [vmem:[%s644_s1 + $0x38] sm:$0xff]  ;;  %v437_v21 = vpack.c.bf16 %v122_v18, %v121_v17  ;;  %v26_v26 = vld [vmem:[%s646_s0] sm:$0xff] }
   0x6   :  { %433 = vmatprep.subr.bf16.mxu1 %v469_v0  ;;  %v428_v22 = vpack.c.bf16 %v34_v20, %v33_v19  ;;  %v123_v23 = vld [vmem:[%s645_s3 + $0x30] sm:$0xff]  ;;  %v124_v24 = vld [vmem:[%s645_s3 + $0x38] sm:$0xff]  ;;  %v125_v27 = vld [vmem:[%s645_s3 + $0x40] sm:$0xff] }
   0x7   :  { %v440_v25 = vpack.c.bf16 %v124_v24, %v123_v23  ;;  %v126_v28 = vld [vmem:[%s645_s3 + $0x48] sm:$0xff]  ;;  %v127_v30 = vld [vmem:[%s645_s3 + $0x50] sm:$0xff]  ;;  %v128_v31 = vld [vmem:[%s645_s3 + $0x58] sm:$0xff] }
   0x8   :  { %423 = vmatpush3.bf16.msra.mxu0 %v422_v7  ;;  %v443_v29 = vpack.c.bf16 %v126_v28, %v125_v27  ;;  %v446_v32 = vpack.c.bf16 %v128_v31, %v127_v30  ;;  %v129_v33 = vld [vmem:[%s645_s3 + $0x60] sm:$0xff]  ;;  %v130_v34 = vld [vmem:[%s645_s3 + $0x68] sm:$0xff]  ;;  %v131_v36 = vld [vmem:[%s645_s3 + $0x70] sm:$0xff] }
   0x9   :  { %424 = vmatprep.subr.bf16.mxu0 %v469_v0  ;;  %435 = vmatpush3.bf16.msra.mxu1 %v434_v15  ;;  %v449_v35 = vpack.c.bf16 %v130_v34, %v129_v33  ;;  %v132_v37 = vld [vmem:[%s645_s3 + $0x78] sm:$0xff]  ;;  %v211_v39 = vld [vmem:[%s647_s5] sm:$0xff]  ;;  %v212_v40 = vld [vmem:[%s647_s5 + $0x8] sm:$0xff] }
   0xa   :  { %436 = vmatprep.subr.bf16.mxu1 %v469_v0  ;;  %v452_v38 = vpack.c.bf16 %v132_v37, %v131_v36  ;;  %v213_v41 = vld [vmem:[%s647_s5 + $0x10] sm:$0xff]  ;;  %v455_v42 = vpack.c.bf16 %v212_v40, %v211_v39  ;;  %v214_v43 = vld [vmem:[%s647_s5 + $0x18] sm:$0xff]  ;;  %v215_v45 = vld [vmem:[%s647_s5 + $0x20] sm:$0xff] }
   0xb   :  { %v458_v44 = vpack.c.bf16 %v214_v43, %v213_v41  ;;  %v216_v46 = vld [vmem:[%s647_s5 + $0x28] sm:$0xff]  ;;  %v305_v48 = vld [vmem:[%s648_s2] ss:$0 sm:$0xff]  ;;  %v217_v53 = vld [vmem:[%s647_s5 + $0x30] sm:$0xff] }
   0xc   :  { %426 = vmatpush3.bf16.msra.mxu0 %v425_v16  ;;  %v461_v47 = vpack.c.bf16 %v216_v46, %v215_v45  ;;  %v218_v54 = vld [vmem:[%s647_s5 + $0x38] sm:$0xff]  ;;  %v307_v56 = vld [vmem:[%s649_s4] ss:$0 sm:$0xff] }
   0xd   :  { %427 = vmatprep.subr.bf16.mxu0 %v469_v0  ;;  %438 = vmatpush3.bf16.msra.mxu1 %v437_v21  ;;  %v464_v55 = vpack.c.bf16 %v218_v54, %v217_v53  ;;  %v308_v61 = vld [vmem:[%s650_s6] ss:$0 sm:$0xff] }
   0xe   :  { %439 = vmatprep.subr.bf16.mxu1 %v469_v0 }
  0x10   :  { %429 = vmatpush3.bf16.msra.mxu0 %v428_v22 }
  0x11   :  { %454 = vmatprep.subr.bf16.mxu0 %v469_v0  ;;  %441 = vmatpush3.bf16.msra.mxu1 %v440_v25 }
  0x12   :  { %442 = vmatprep.subr.bf16.mxu1 %v469_v0 }
  0x13   :  { %362 = vmatmul.mubr.msk.f32.vlgmr.msra.gmra.mrb[0].mxu0 %vm42_vm1, %v26_v26 }
  0x14   :  { %415 = vmatprep.mubr.msk.f32.mxu0 %vm470_vm0, %v471_v4  ;;  %456 = vmatpush3.bf16.msra.mxu0 %v455_v42 }
  0x15   :  { %444 = vmatpush3.bf16.msra.mxu1 %v443_v29  ;;  %457 = vmatprep.subr.bf16.mxu0 %v469_v0 }
  0x16   :  { %445 = vmatprep.subr.bf16.mxu1 %v469_v0 }
  0x18   :  { %459 = vmatpush3.bf16.msra.mxu0 %v458_v44 }
  0x19   :  { %447 = vmatpush3.bf16.msra.mxu1 %v446_v32  ;;  %460 = vmatprep.subr.bf16.mxu0 %v469_v0 }
  0x1a   :  { %448 = vmatprep.subr.bf16.mxu1 %v469_v0 }
  0x1c   :  { %462 = vmatpush3.bf16.msra.mxu0 %v461_v47 }
  0x1d   :  { %450 = vmatpush3.bf16.msra.mxu1 %v449_v35  ;;  %463 = vmatprep.subr.bf16.mxu0 %v469_v0 }
  0x1e   :  { %451 = vmatprep.subr.bf16.mxu1 %v469_v0 }
  0x20   :  { %465 = vmatpush3.bf16.msra.mxu0 %v464_v55 }
  0x21   :  { %453 = vmatpush3.bf16.msra.mxu1 %v452_v38 }
  0xe6   :  { %v112_v49 = vpop.f32.mrb[0].mxu0 }
  0xe7   :  { %v113_v50 = vadd.f32 %v305_v48, %v112_v49  ;;  %v363_v51 = vpop.f32.mrb[1].mxu0 }
  0xe9   :  { %v116_v52 = vmax.f32 %v113_v50, 0.0 }
  0xeb   :  { %397 = vmatmul.mubr.f32.vlgmr.msra.gmra.mrb[0].mxu1 %v116_v52 }
 0x1be   :  { %v206_v57 = vpop.f32.mrb[0].mxu1 }
 0x1bf   :  { %v207_v58 = vadd.f32 %v307_v56, %v206_v57  ;;  %v398_v59 = vpop.f32.mrb[1].mxu1 }
 0x1c1   :  { %v210_v60 = vmax.f32 %v207_v58, 0.0 }
 0x1c3   :  { %416 = vmatmul.mubr.msk.f32.vlgmr.msra.gmra.mrb[2].mxu0 %vm42_vm1, %v210_v60 }
 0x296   :  { %v295_v62 = vpop.f32.mrb[2].mxu0 }
 0x297   :  { %v296_v63 = vadd.f32 %v308_v61, %v295_v62  ;;  %v417_v0 = vpop.f32.mrb[3].mxu0 }
 0x299   :  { %300 = vst.msk [vmem:[%s651_s7] sm:$0xff] %vm299_vm2, %v296_v63 }

</bundles_post_ra>
